<compile_context>
chip_gen: v6e
topology: v6e:2x2x1
jax: 0.10.0
libtpu: 0.0.40
codegen_flags: <defaults>
</compile_context>

<pallas_src>
import math
import functools

import jax
import jax.numpy as jnp
from jax import lax
from jax.experimental import pallas as pl
from jax.experimental.pallas import tpu as pltpu

BN_EPS = 1e-5
_INV_SQRT2 = 1.0 / math.sqrt(2.0)


def _gelu_exact(x):
    # PyTorch nn.GELU() default: 0.5 * x * (1 + erf(x / sqrt(2)))
    return 0.5 * x * (1.0 + lax.erf(x * _INV_SQRT2))


def _batchnorm_train(x, gamma, beta):
    # Training-mode BatchNorm1d over the batch axis, one-pass stats:
    # var = E[x^2] - mean^2 (biased), eps = 1e-5.
    inv_b = 1.0 / x.shape[0]
    s1 = jnp.sum(x, axis=0, keepdims=True)
    s2 = jnp.sum(x * x, axis=0, keepdims=True)
    mean = s1 * inv_b
    var = jnp.maximum(s2 * inv_b - mean * mean, 0.0)
    return (x - mean) * lax.rsqrt(var + BN_EPS) * gamma + beta


# --------------------------------------------------------------------------------------
# Kernel 1: encoder + decoder-middle.  Grid axis = F tiles, used as a K-reduction.
#   accumulate  acc += x_tile @ W1_tile            (every step)
#   at the last step: BN + GELU + Linear(H->H) -> feat ; Linear(H->H) + BN + GELU -> d
# --------------------------------------------------------------------------------------
def _encode_kernel(x_ref, w1_ref, vec_ref, w2_ref, w3_ref, feat_ref, d_ref, acc_ref):
    f = pl.program_id(0)

    @pl.when(f == 0)
    def _():
        acc_ref[...] = jnp.zeros_like(acc_ref)

    acc_ref[...] += jnp.dot(x_ref[...], w1_ref[...], preferred_element_type=jnp.float32)

    @pl.when(f == pl.num_programs(0) - 1)
    def _():
        # packed vectors: rows = [b1, g1, be1, b2, b3, g3, be3, pad]
        b1, g1, be1 = vec_ref[0:1, :], vec_ref[1:2, :], vec_ref[2:3, :]
        b2 = vec_ref[3:4, :]
        b3, g3, be3 = vec_ref[4:5, :], vec_ref[5:6, :], vec_ref[6:7, :]

        h = _gelu_exact(_batchnorm_train(acc_ref[...] + b1, g1, be1))
        feat = jnp.dot(h, w2_ref[...], preferred_element_type=jnp.float32) + b2
        feat_ref[...] = feat.astype(feat_ref.dtype)

        d = jnp.dot(feat, w3_ref[...], preferred_element_type=jnp.float32) + b3
        d = _gelu_exact(_batchnorm_train(d, g3, be3))
        d_ref[...] = d.astype(d_ref.dtype)


# --------------------------------------------------------------------------------------
# Kernel 2: final Linear(H->F).  Grid axis = F tiles, used as an independent N axis.
# --------------------------------------------------------------------------------------
def _decode_kernel(d_ref, w4_ref, b4_ref, rec_ref):
    rec_ref[...] = (
        jnp.dot(d_ref[...], w4_ref[...], preferred_element_type=jnp.float32) + b4_ref[...]
    ).astype(rec_ref.dtype)


def _pick_tile(F):
    for t in (2048, 1024, 512, 256, 128):
        if F % t == 0:
            return t
    return F  # ragged F: keep it whole (block dim equals full array dim)


_VMEM_LIMIT = 48 * 1024 * 1024  # explicit scoped-VMEM limit with headroom (v7x-safe)


@functools.partial(jax.jit, static_argnames=("only_encoder",))
def autoencoder_forward(masks, params, only_encoder=False):
    """masks: [B, F] float32.  Returns (features [B, H], reconstruction [B, F])."""
    B, F = masks.shape
    H = params["w1"].shape[1]
    tF = _pick_tile(F)
    nF = F // tF

    # Pack the seven small (1, H) vectors into one sublane-aligned (8, H) slab -> single DMA.
    vecs = jnp.concatenate(
        [params["b1"], params["g1"], params["be1"], params["b2"],
         params["b3"], params["g3"], params["be3"],
         jnp.zeros((1, H), jnp.float32)],
        axis=0,
    )

    enc_cost = pl.CostEstimate(
        flops=int(2 * B * H * (F + 2 * H)),
        transcendentals=int(2 * B * H),
        bytes_accessed=int(4 * (B * F + F * H + 2 * H * H + 8 * H + 2 * B * H)),
    )
    feat, d = pl.pallas_call(
        _encode_kernel,
        out_shape=(
            jax.ShapeDtypeStruct((B, H), jnp.float32),
            jax.ShapeDtypeStruct((B, H), jnp.float32),
        ),
        grid_spec=pltpu.PrefetchScalarGridSpec(
            num_scalar_prefetch=0,
            grid=(nF,),
            in_specs=[
                pl.BlockSpec((B, tF), lambda f: (0, f)),   # x       : K-streamed
                pl.BlockSpec((tF, H), lambda f: (f, 0)),   # W1      : K-streamed
                pl.BlockSpec((8, H), lambda f: (0, 0)),    # packed vectors : resident
                pl.BlockSpec((H, H), lambda f: (0, 0)),    # W2      : resident
                pl.BlockSpec((H, H), lambda f: (0, 0)),    # W3      : resident
            ],
            out_specs=(
                pl.BlockSpec((B, H), lambda f: (0, 0)),    # feat (written on last step)
                pl.BlockSpec((B, H), lambda f: (0, 0)),    # d    (written on last step)
            ),
            scratch_shapes=[pltpu.VMEM((B, H), jnp.float32)],
        ),
        compiler_params=pltpu.CompilerParams(
            dimension_semantics=("arbitrary",),            # K-reduction axis
            vmem_limit_bytes=_VMEM_LIMIT,
        ),
        cost_estimate=enc_cost,
    )(masks, params["w1"], vecs, params["w2"], params["w3"])

    if only_encoder:
        return feat

    dec_cost = pl.CostEstimate(
        flops=int(2 * B * H * F),
        transcendentals=0,
        bytes_accessed=int(4 * (B * H + H * F + F + B * F)),
    )
    rec = pl.pallas_call(
        _decode_kernel,
        out_shape=jax.ShapeDtypeStruct((B, F), jnp.float32),
        grid_spec=pltpu.PrefetchScalarGridSpec(
            num_scalar_prefetch=0,
            grid=(nF,),
            in_specs=[
                pl.BlockSpec((B, H), lambda f: (0, 0)),    # d  : resident
                pl.BlockSpec((H, tF), lambda f: (0, f)),   # W4 : N-streamed
                pl.BlockSpec((1, tF), lambda f: (0, f)),   # b4 : N-streamed
            ],
            out_specs=pl.BlockSpec((B, tF), lambda f: (0, f)),  # rec tile (lane-dense)
        ),
        compiler_params=pltpu.CompilerParams(
            dimension_semantics=("parallel",),             # independent N axis (megacore)
            vmem_limit_bytes=_VMEM_LIMIT,
        ),
        cost_estimate=dec_cost,
    )(d, params["w4"], params["b4"])

    return feat, rec


def init_params(key, num_faces, hidden):
    """PyTorch-style Linear init.  Weights stored pre-transposed as [in, out]."""
    def linear(k, fan_in, fan_out):
        kw, kb = jax.random.split(k)
        bound = 1.0 / math.sqrt(fan_in)
        w = jax.random.uniform(kw, (fan_in, fan_out), jnp.float32, -bound, bound)
        b = jax.random.uniform(kb, (1, fan_out), jnp.float32, -bound, bound)
        return w, b

    k1, k2, k3, k4 = jax.random.split(key, 4)
    w1, b1 = linear(k1, num_faces, hidden)
    w2, b2 = linear(k2, hidden, hidden)
    w3, b3 = linear(k3, hidden, hidden)
    w4, b4 = linear(k4, hidden, num_faces)
    return {
        "w1": w1, "b1": b1,
        "g1": jnp.ones((1, hidden), jnp.float32), "be1": jnp.zeros((1, hidden), jnp.float32),
        "w2": w2, "b2": b2,
        "w3": w3, "b3": b3,
        "g3": jnp.ones((1, hidden), jnp.float32), "be3": jnp.zeros((1, hidden), jnp.float32),
        "w4": w4, "b4": b4,
    }


def reference_forward(masks, params):
    # Pure-JAX reference with PyTorch-exact two-pass BN stats and exact-erf GELU.
    def bn(x, gamma, beta):
        mean = jnp.mean(x, axis=0, keepdims=True)
        var = jnp.mean((x - mean) * (x - mean), axis=0, keepdims=True)
        return (x - mean) / jnp.sqrt(var + BN_EPS) * gamma + beta

    h = masks @ params["w1"] + params["b1"]
    h = _gelu_exact(bn(h, params["g1"], params["be1"]))
    feat = h @ params["w2"] + params["b2"]
    d = feat @ params["w3"] + params["b3"]
    d = _gelu_exact(bn(d, params["g3"], params["be3"]))
    rec = d @ params["w4"] + params["b4"]
    return feat, rec


if __name__ == "__main__":
    # Small shapes; F=384 -> three 128-wide F tiles so both grids actually iterate.
    B, NUM_FACES, HIDDEN = 8, 384, 128

    key = jax.random.PRNGKey(0)
    k_x, k_p = jax.random.split(key)
    masks = jax.random.normal(k_x, (B, NUM_FACES), jnp.float32)
    params = init_params(k_p, NUM_FACES, HIDDEN)

    feat, rec = jax.block_until_ready(autoencoder_forward(masks, params))

    feat_ref, rec_ref = reference_forward(masks, params)
    assert feat.shape == (B, HIDDEN) and rec.shape == (B, NUM_FACES)
    assert jnp.allclose(feat, feat_ref, atol=2e-4, rtol=2e-4)
    assert jnp.allclose(rec, rec_ref, atol=2e-4, rtol=2e-4)

    # TODO(synk): BatchNorm1d running_mean/running_var buffer updates (training-mode side
    # effect in PyTorch) are not materialized; only the forward outputs are produced.
    print("KERNEL_OK")
</pallas_src>

<mosaic_0001>
module attributes {stable_mosaic.version = 11 : i64} {
  func.func @_decode_kernel(%arg0: i32, %arg1: memref<8x128xf32, #tpu.memory_space<vmem>>, %arg2: memref<128x128xf32, #tpu.memory_space<vmem>>, %arg3: memref<1x128xf32, #tpu.memory_space<vmem>>, %arg4: memref<8x128xf32, #tpu.memory_space<vmem>>) attributes {dimension_semantics = [#tpu.dimension_semantics<parallel>], iteration_bounds = array<i64: 3>, scalar_prefetch = 0 : i64, scratch_operands = 0 : i64, tpu.core_type = #tpu.core_type<tc>, window_params = [{pipeline_mode = #tpu.pipeline_mode<synchronous>, transform_indices = @transform_0, window_bounds = array<i64: 8, 128>}, {transform_indices = @transform_1, window_bounds = array<i64: 128, 128>}, {transform_indices = @transform_2, window_bounds = array<i64: 1, 128>}, {transform_indices = @transform_3, window_bounds = array<i64: 8, 128>}]} {
    %c0 = arith.constant 0 : index
    %c0_0 = arith.constant 0 : index
    %0 = vector.load %arg1[%c0, %c0_0] : memref<8x128xf32, #tpu.memory_space<vmem>>, vector<8x128xf32>
    %c0_1 = arith.constant 0 : index
    %c0_2 = arith.constant 0 : index
    %1 = vector.load %arg2[%c0_1, %c0_2] : memref<128x128xf32, #tpu.memory_space<vmem>>, vector<128x128xf32>
    %cst = arith.constant dense<0.000000e+00> : vector<8x128xf32>
    %2 = tpu.matmul %0, %1, %cst {dimension_numbers = #tpu.dot_dimension_numbers<[1], [0], [0], [1], [0, 0, 1, 1], [], []>} : vector<8x128xf32>, vector<128x128xf32>, vector<8x128xf32> -> vector<8x128xf32>
    %c0_3 = arith.constant 0 : index
    %c0_4 = arith.constant 0 : index
    %3 = vector.load %arg3[%c0_3, %c0_4] : memref<1x128xf32, #tpu.memory_space<vmem>>, vector<1x128xf32>
    %4 = vector.broadcast %3 : vector<1x128xf32> to vector<8x128xf32>
    %5 = arith.addf %2, %4 : vector<8x128xf32>
    %c0_5 = arith.constant 0 : index
    %c0_6 = arith.constant 0 : index
    %6 = vector.load %arg4[%c0_5, %c0_6] : memref<8x128xf32, #tpu.memory_space<vmem>>, vector<8x128xf32>
    tpu.vector_store %arg4[%c0_5, %c0_6], %5 {strides = array<i32>} : memref<8x128xf32, #tpu.memory_space<vmem>>, vector<8x128xf32>,
    return
  }
  func.func @transform_0(%arg0: i32) -> (i32, i32) {
    %c0_i32 = arith.constant 0 : i32
    %c0_i32_0 = arith.constant 0 : i32
    %c0_i32_1 = arith.constant 0 : i32
    return %c0_i32, %c0_i32_0 : i32, i32
  }
  func.func @transform_1(%arg0: i32) -> (i32, i32) {
    %c0_i32 = arith.constant 0 : i32
    %c0_i32_0 = arith.constant 0 : i32
    return %c0_i32, %arg0 : i32, i32
  }
  func.func @transform_2(%arg0: i32) -> (i32, i32) {
    %c0_i32 = arith.constant 0 : i32
    %c0_i32_0 = arith.constant 0 : i32
    return %c0_i32, %arg0 : i32, i32
  }
  func.func @transform_3(%arg0: i32) -> (i32, i32) {
    %c0_i32 = arith.constant 0 : i32
    %c0_i32_0 = arith.constant 0 : i32
    return %c0_i32, %arg0 : i32, i32
  }
}

module attributes {stable_mosaic.version = 11 : i64} {
  func.func @_encode_kernel(%arg0: i32, %arg1: memref<8x128xf32, #tpu.memory_space<vmem>>, %arg2: memref<128x128xf32, #tpu.memory_space<vmem>>, %arg3: memref<8x128xf32, #tpu.memory_space<vmem>>, %arg4: memref<128x128xf32, #tpu.memory_space<vmem>>, %arg5: memref<128x128xf32, #tpu.memory_space<vmem>>, %arg6: memref<8x128xf32, #tpu.memory_space<vmem>>, %arg7: memref<8x128xf32, #tpu.memory_space<vmem>>, %arg8: memref<8x128xf32, #tpu.memory_space<vmem>>) attributes {dimension_semantics = [#tpu.dimension_semantics<arbitrary>], iteration_bounds = array<i64: 3>, scalar_prefetch = 0 : i64, scratch_operands = 1 : i64, tpu.core_type = #tpu.core_type<tc>, window_params = [{transform_indices = @transform_0, window_bounds = array<i64: 8, 128>}, {transform_indices = @transform_1, window_bounds = array<i64: 128, 128>}, {pipeline_mode = #tpu.pipeline_mode<synchronous>, transform_indices = @transform_2, window_bounds = array<i64: 8, 128>}, {pipeline_mode = #tpu.pipeline_mode<synchronous>, transform_indices = @transform_3, window_bounds = array<i64: 128, 128>}, {pipeline_mode = #tpu.pipeline_mode<synchronous>, transform_indices = @transform_4, window_bounds = array<i64: 128, 128>}, {pipeline_mode = #tpu.pipeline_mode<synchronous>, transform_indices = @transform_5, window_bounds = array<i64: 8, 128>}, {pipeline_mode = #tpu.pipeline_mode<synchronous>, transform_indices = @transform_6, window_bounds = array<i64: 8, 128>}]} {
    %c0_i32 = arith.constant 0 : i32
    %0 = arith.cmpi eq, %arg0, %c0_i32 : i32
    %1 = arith.extui %0 : i1 to i32
    %c0_i32_0 = arith.constant 0 : i32
    %2 = arith.cmpi ne, %1, %c0_i32_0 : i32
    scf.if %2 {
      %cst_9 = arith.constant 0.000000e+00 : f32
      %12 = vector.broadcast %cst_9 : f32 to vector<8x128xf32>
      %c0_10 = arith.constant 0 : index
      %c0_11 = arith.constant 0 : index
      %13 = vector.load %arg8[%c0_10, %c0_11] : memref<8x128xf32, #tpu.memory_space<vmem>>, vector<8x128xf32>
      tpu.vector_store %arg8[%c0_10, %c0_11], %12 {strides = array<i32>} : memref<8x128xf32, #tpu.memory_space<vmem>>, vector<8x128xf32>,
    } else {
    }
    %c0 = arith.constant 0 : index
    %c0_1 = arith.constant 0 : index
    %3 = vector.load %arg8[%c0, %c0_1] : memref<8x128xf32, #tpu.memory_space<vmem>>, vector<8x128xf32>
    %c0_2 = arith.constant 0 : index
    %c0_3 = arith.constant 0 : index
    %4 = vector.load %arg1[%c0_2, %c0_3] : memref<8x128xf32, #tpu.memory_space<vmem>>, vector<8x128xf32>
    %c0_4 = arith.constant 0 : index
    %c0_5 = arith.constant 0 : index
    %5 = vector.load %arg2[%c0_4, %c0_5] : memref<128x128xf32, #tpu.memory_space<vmem>>, vector<128x128xf32>
    %cst = arith.constant dense<0.000000e+00> : vector<8x128xf32>
    %6 = tpu.matmul %4, %5, %cst {dimension_numbers = #tpu.dot_dimension_numbers<[1], [0], [0], [1], [0, 0, 1, 1], [], []>} : vector<8x128xf32>, vector<128x128xf32>, vector<8x128xf32> -> vector<8x128xf32>
    %7 = arith.addf %3, %6 : vector<8x128xf32>
    %c0_6 = arith.constant 0 : index
    %c0_7 = arith.constant 0 : index
    %8 = vector.load %arg8[%c0_6, %c0_7] : memref<8x128xf32, #tpu.memory_space<vmem>>, vector<8x128xf32>
    tpu.vector_store %arg8[%c0_6, %c0_7], %7 {strides = array<i32>} : memref<8x128xf32, #tpu.memory_space<vmem>>, vector<8x128xf32>,
    %c2_i32 = arith.constant 2 : i32
    %9 = arith.cmpi eq, %arg0, %c2_i32 : i32
    %10 = arith.extui %9 : i1 to i32
    %c0_i32_8 = arith.constant 0 : i32
    %11 = arith.cmpi ne, %10, %c0_i32_8 : i32
    scf.if %11 {
      %c0_9 = arith.constant 0 : index
      %c0_10 = arith.constant 0 : index
      %12 = vector.load %arg3[%c0_9, %c0_10] : memref<8x128xf32, #tpu.memory_space<vmem>>, vector<1x128xf32>
      %c1 = arith.constant 1 : index
      %c0_11 = arith.constant 0 : index
      %13 = vector.load %arg3[%c1, %c0_11] : memref<8x128xf32, #tpu.memory_space<vmem>>, vector<1x128xf32>
      %c2 = arith.constant 2 : index
      %c0_12 = arith.constant 0 : index
      %14 = vector.load %arg3[%c2, %c0_12] : memref<8x128xf32, #tpu.memory_space<vmem>>, vector<1x128xf32>
      %c3 = arith.constant 3 : index
      %c0_13 = arith.constant 0 : index
      %15 = vector.load %arg3[%c3, %c0_13] : memref<8x128xf32, #tpu.memory_space<vmem>>, vector<1x128xf32>
      %c4 = arith.constant 4 : index
      %c0_14 = arith.constant 0 : index
      %16 = vector.load %arg3[%c4, %c0_14] : memref<8x128xf32, #tpu.memory_space<vmem>>, vector<1x128xf32>
      %c5 = arith.constant 5 : index
      %c0_15 = arith.constant 0 : index
      %17 = vector.load %arg3[%c5, %c0_15] : memref<8x128xf32, #tpu.memory_space<vmem>>, vector<1x128xf32>
      %c6 = arith.constant 6 : index
      %c0_16 = arith.constant 0 : index
      %18 = vector.load %arg3[%c6, %c0_16] : memref<8x128xf32, #tpu.memory_space<vmem>>, vector<1x128xf32>
      %c0_17 = arith.constant 0 : index
      %c0_18 = arith.constant 0 : index
      %19 = vector.load %arg8[%c0_17, %c0_18] : memref<8x128xf32, #tpu.memory_space<vmem>>, vector<8x128xf32>
      %20 = vector.broadcast %12 : vector<1x128xf32> to vector<8x128xf32>
      %21 = arith.addf %19, %20 : vector<8x128xf32>
      %cst_19 = arith.constant dense<0.000000e+00> : vector<128xf32>
      %22 = vector.multi_reduction <add>, %21, %cst_19 [0] : vector<8x128xf32> to vector<128xf32>
      %23 = vector.shape_cast %22 : vector<128xf32> to vector<1x128xf32>
      %24 = arith.mulf %21, %21 : vector<8x128xf32>
      %cst_20 = arith.constant dense<0.000000e+00> : vector<128xf32>
      %25 = vector.multi_reduction <add>, %24, %cst_20 [0] : vector<8x128xf32> to vector<128xf32>
      %26 = vector.shape_cast %25 : vector<128xf32> to vector<1x128xf32>
      %cst_21 = arith.constant 1.250000e-01 : f32
      %27 = vector.broadcast %cst_21 : f32 to vector<1x128xf32>
      %28 = arith.mulf %23, %27 : vector<1x128xf32>
      %cst_22 = arith.constant 1.250000e-01 : f32
      %29 = vector.broadcast %cst_22 : f32 to vector<1x128xf32>
      %30 = arith.mulf %26, %29 : vector<1x128xf32>
      %31 = arith.mulf %28, %28 : vector<1x128xf32>
      %32 = arith.subf %30, %31 : vector<1x128xf32>
      %cst_23 = arith.constant 0.000000e+00 : f32
      %33 = vector.broadcast %cst_23 : f32 to vector<1x128xf32>
      %34 = arith.maximumf %32, %33 : vector<1x128xf32>
      %35 = vector.broadcast %28 : vector<1x128xf32> to vector<8x128xf32>
      %36 = arith.subf %21, %35 : vector<8x128xf32>
      %cst_24 = arith.constant 9.99999974E-6 : f32
      %37 = vector.broadcast %cst_24 : f32 to vector<1x128xf32>
      %38 = arith.addf %34, %37 : vector<1x128xf32>
      %39 = math.rsqrt %38 : vector<1x128xf32>
      %40 = vector.broadcast %39 : vector<1x128xf32> to vector<8x128xf32>
      %41 = arith.mulf %36, %40 : vector<8x128xf32>
      %42 = vector.broadcast %13 : vector<1x128xf32> to vector<8x128xf32>
      %43 = arith.mulf %41, %42 : vector<8x128xf32>
      %44 = vector.broadcast %14 : vector<1x128xf32> to vector<8x128xf32>
      %45 = arith.addf %43, %44 : vector<8x128xf32>
      %cst_25 = arith.constant 5.000000e-01 : f32
      %46 = vector.broadcast %cst_25 : f32 to vector<8x128xf32>
      %47 = arith.mulf %46, %45 : vector<8x128xf32>
      %cst_26 = arith.constant 0.707106769 : f32
      %48 = vector.broadcast %cst_26 : f32 to vector<8x128xf32>
      %49 = arith.mulf %45, %48 : vector<8x128xf32>
      %50 = math.erf %49 : vector<8x128xf32>
      %cst_27 = arith.constant 1.000000e+00 : f32
      %51 = vector.broadcast %cst_27 : f32 to vector<8x128xf32>
      %52 = arith.addf %51, %50 : vector<8x128xf32>
      %53 = arith.mulf %47, %52 : vector<8x128xf32>
      %c0_28 = arith.constant 0 : index
      %c0_29 = arith.constant 0 : index
      %54 = vector.load %arg4[%c0_28, %c0_29] : memref<128x128xf32, #tpu.memory_space<vmem>>, vector<128x128xf32>
      %cst_30 = arith.constant dense<0.000000e+00> : vector<8x128xf32>
      %55 = tpu.matmul %53, %54, %cst_30 {dimension_numbers = #tpu.dot_dimension_numbers<[1], [0], [0], [1], [0, 0, 1, 1], [], []>} : vector<8x128xf32>, vector<128x128xf32>, vector<8x128xf32> -> vector<8x128xf32>
      %56 = vector.broadcast %15 : vector<1x128xf32> to vector<8x128xf32>
      %57 = arith.addf %55, %56 : vector<8x128xf32>
      %c0_31 = arith.constant 0 : index
      %c0_32 = arith.constant 0 : index
      %58 = vector.load %arg6[%c0_31, %c0_32] : memref<8x128xf32, #tpu.memory_space<vmem>>, vector<8x128xf32>
      tpu.vector_store %arg6[%c0_31, %c0_32], %57 {strides = array<i32>} : memref<8x128xf32, #tpu.memory_space<vmem>>, vector<8x128xf32>,
      %c0_33 = arith.constant 0 : index
      %c0_34 = arith.constant 0 : index
      %59 = vector.load %arg5[%c0_33, %c0_34] : memref<128x128xf32, #tpu.memory_space<vmem>>, vector<128x128xf32>
      %cst_35 = arith.constant dense<0.000000e+00> : vector<8x128xf32>
      %60 = tpu.matmul %57, %59, %cst_35 {dimension_numbers = #tpu.dot_dimension_numbers<[1], [0], [0], [1], [0, 0, 1, 1], [], []>} : vector<8x128xf32>, vector<128x128xf32>, vector<8x128xf32> -> vector<8x128xf32>
      %61 = vector.broadcast %16 : vector<1x128xf32> to vector<8x128xf32>
      %62 = arith.addf %60, %61 : vector<8x128xf32>
      %cst_36 = arith.constant dense<0.000000e+00> : vector<128xf32>
      %63 = vector.multi_reduction <add>, %62, %cst_36 [0] : vector<8x128xf32> to vector<128xf32>
      %64 = vector.shape_cast %63 : vector<128xf32> to vector<1x128xf32>
      %65 = arith.mulf %62, %62 : vector<8x128xf32>
      %cst_37 = arith.constant dense<0.000000e+00> : vector<128xf32>
      %66 = vector.multi_reduction <add>, %65, %cst_37 [0] : vector<8x128xf32> to vector<128xf32>
      %67 = vector.shape_cast %66 : vector<128xf32> to vector<1x128xf32>
      %cst_38 = arith.constant 1.250000e-01 : f32
      %68 = vector.broadcast %cst_38 : f32 to vector<1x128xf32>
      %69 = arith.mulf %64, %68 : vector<1x128xf32>
      %cst_39 = arith.constant 1.250000e-01 : f32
      %70 = vector.broadcast %cst_39 : f32 to vector<1x128xf32>
      %71 = arith.mulf %67, %70 : vector<1x128xf32>
      %72 = arith.mulf %69, %69 : vector<1x128xf32>
      %73 = arith.subf %71, %72 : vector<1x128xf32>
      %cst_40 = arith.constant 0.000000e+00 : f32
      %74 = vector.broadcast %cst_40 : f32 to vector<1x128xf32>
      %75 = arith.maximumf %73, %74 : vector<1x128xf32>
      %76 = vector.broadcast %69 : vector<1x128xf32> to vector<8x128xf32>
      %77 = arith.subf %62, %76 : vector<8x128xf32>
      %cst_41 = arith.constant 9.99999974E-6 : f32
      %78 = vector.broadcast %cst_41 : f32 to vector<1x128xf32>
      %79 = arith.addf %75, %78 : vector<1x128xf32>
      %80 = math.rsqrt %79 : vector<1x128xf32>
      %81 = vector.broadcast %80 : vector<1x128xf32> to vector<8x128xf32>
      %82 = arith.mulf %77, %81 : vector<8x128xf32>
      %83 = vector.broadcast %17 : vector<1x128xf32> to vector<8x128xf32>
      %84 = arith.mulf %82, %83 : vector<8x128xf32>
      %85 = vector.broadcast %18 : vector<1x128xf32> to vector<8x128xf32>
      %86 = arith.addf %84, %85 : vector<8x128xf32>
      %cst_42 = arith.constant 5.000000e-01 : f32
      %87 = vector.broadcast %cst_42 : f32 to vector<8x128xf32>
      %88 = arith.mulf %87, %86 : vector<8x128xf32>
      %cst_43 = arith.constant 0.707106769 : f32
      %89 = vector.broadcast %cst_43 : f32 to vector<8x128xf32>
      %90 = arith.mulf %86, %89 : vector<8x128xf32>
      %91 = math.erf %90 : vector<8x128xf32>
      %cst_44 = arith.constant 1.000000e+00 : f32
      %92 = vector.broadcast %cst_44 : f32 to vector<8x128xf32>
      %93 = arith.addf %92, %91 : vector<8x128xf32>
      %94 = arith.mulf %88, %93 : vector<8x128xf32>
      %c0_45 = arith.constant 0 : index
      %c0_46 = arith.constant 0 : index
      %95 = vector.load %arg7[%c0_45, %c0_46] : memref<8x128xf32, #tpu.memory_space<vmem>>, vector<8x128xf32>
      tpu.vector_store %arg7[%c0_45, %c0_46], %94 {strides = array<i32>} : memref<8x128xf32, #tpu.memory_space<vmem>>, vector<8x128xf32>,
    } else {
    }
    return
  }
  func.func @transform_0(%arg0: i32) -> (i32, i32) {
    %c0_i32 = arith.constant 0 : i32
    %c0_i32_0 = arith.constant 0 : i32
    return %c0_i32, %arg0 : i32, i32
  }
  func.func @transform_1(%arg0: i32) -> (i32, i32) {
    %c0_i32 = arith.constant 0 : i32
    %c0_i32_0 = arith.constant 0 : i32
    return %arg0, %c0_i32 : i32, i32
  }
  func.func @transform_2(%arg0: i32) -> (i32, i32) {
    %c0_i32 = arith.constant 0 : i32
    %c0_i32_0 = arith.constant 0 : i32
    %c0_i32_1 = arith.constant 0 : i32
    return %c0_i32, %c0_i32_0 : i32, i32
  }
  func.func @transform_3(%arg0: i32) -> (i32, i32) {
    %c0_i32 = arith.constant 0 : i32
    %c0_i32_0 = arith.constant 0 : i32
    %c0_i32_1 = arith.constant 0 : i32
    return %c0_i32, %c0_i32_0 : i32, i32
  }
  func.func @transform_4(%arg0: i32) -> (i32, i32) {
    %c0_i32 = arith.constant 0 : i32
    %c0_i32_0 = arith.constant 0 : i32
    %c0_i32_1 = arith.constant 0 : i32
    return %c0_i32, %c0_i32_0 : i32, i32
  }
  func.func @transform_5(%arg0: i32) -> (i32, i32) {
    %c0_i32 = arith.constant 0 : i32
    %c0_i32_0 = arith.constant 0 : i32
    %c0_i32_1 = arith.constant 0 : i32
    return %c0_i32, %c0_i32_0 : i32, i32
  }
  func.func @transform_6(%arg0: i32) -> (i32, i32) {
    %c0_i32 = arith.constant 0 : i32
    %c0_i32_0 = arith.constant 0 : i32
    %c0_i32_1 = arith.constant 0 : i32
    return %c0_i32, %c0_i32_0 : i32, i32
  }
}

</mosaic_0001>

<bundles_post_ra>
// kernel: autoencoder_forward.3
= control target key start
LH: loop header
LB: loop body
LE: loop exit
PB: predicated region body
PF: predicated region fallthrough
CT: control target
= control target key end

     0   :  { %8 = vsyncpa [#allocation4], 0  ;;  %s796_s0 = inlined_call_operand.vmem [shape: f32[8,128], index: 0, kind: input, shape index: {}]   ;;  %s797_s1 = inlined_call_operand.vmem [shape: f32[128,384], index: 1, kind: input, shape index: {}]   ;;  %s798_s2 = inlined_call_operand.vmem [shape: f32[1,384], index: 2, kind: input, shape index: {}]   ;;  %s799_s3 = inlined_call_operand.hbm [shape: f32[8,384], index: 3, kind: output, shape index: {}]  }
   0x1   :  { %10 = vsyncpa [#allocation4 + $0x1], 0  ;;  %s652_s12 = smov 0   ;;  %s654_s13 = smov 0  }
   0x2   :  { %s656_s14 = smov 0   ;;  %s658_s15 = smov 0  }
   0x3 LB: > { %s673_s16 = sadd.s32 4294967295, %s627_s15   ;;  %s461_s17 = sadd.s32 4294967294, %s627_s15   ;;  %s627_s15 = sphi %s658_s15, %s805_s15   ;;  %s623_s14 = sphi %s656_s14, %s804_s14   ;;  %s619_s13 = sphi %s654_s13, %s803_s13   ;;  %s615_s12 = sphi %s652_s12, %s802_s12  }
   0x4   : > { %s677_s18 = sadd.s32 1, %s627_s15   ;;  %s44_s19 = sadd.s32 1, %s623_s14 }
   0x5   : > { %s41_s20 = ssub.s32 %s627_s15, %s677_s18  ;;  %p51_p0 = scmp.ne.s32.totalorder %s623_s14, %s619_s13 }
   0x6   : > { %p42_p1 = scmp.eq.s32.totalorder %s41_s20, 0  ;;  %p52_p2 = scmp.eq.s32.totalorder %s627_s15, 0 }
   0x7   : > { %p107_p3 = scmp.eq.s32.totalorder %s673_s16, 2  ;;  %p112_p4 = scmp.ne.s32.totalorder %s619_s13, %s615_s12 }
   0x8   : > { %s689_s21 = scalar_select %p42_p1, %s623_s14, %s44_s19  }
   0x9   : > { %p53_p5 = por %p52_p2, %p51_p0  ;;  %p691_p6 = por %p107_p3, %p51_p0 }
   0xa   : > { %p113_p7 = scmp.eq.s32.totalorder %s461_s17, 2  ;;  %p463_p9 = scmp.ge.s32.totalorder %s627_s15, 3 }
   0xc   : > { %p695_p8 = por %p113_p7, %p112_p4  ;;  %132 = sbr.rel (%p463_p9) target bundleno = 29 (0x1d), region = 20 }
  0x11   : > { %135 = sbr.rel (!%p53_p5) target bundleno = 29 (0x1d), region = 24  ;;  %s137_s24 = sand.u32 (%p53_p5), 1, %s623_s14  }
  0x12   : > { %s465_s25 = sshll.u32 (%p53_p5), %s627_s15, 3  ;;  %s464_s26 = sshll.u32 (%p53_p5), %s137_s24, 7 }
  0x13   : > { %s705_s29 = scalar_lea.vmem (%p53_p5), %s797_s1, %s465_s25  ;;  %s139_s30 = scalar_lea.vmem (%p53_p5), [#allocation2], %s464_s26 }
  0x14   : > { %v200_v0 = vld [vmem:[%s705_s29] sm:$0xff] (%p53_p5)  ;;  %v202_v1 = vld [vmem:[%s705_s29 + $0x18] sm:$0xff] (%p53_p5)  ;;  %v204_v2 = vld [vmem:[%s705_s29 + $0x30] sm:$0xff] (%p53_p5) }
  0x15   : > { %201 = vst [vmem:[%s139_s30] sm:$0xff] (%p53_p5), %v200_v0  ;;  %203 = vst [vmem:[%s139_s30 + $0x8] sm:$0xff] (%p53_p5), %v202_v1  ;;  %v206_v3 = vld [vmem:[%s705_s29 + $0x48] sm:$0xff] (%p53_p5)  ;;  %v208_v4 = vld [vmem:[%s705_s29 + $0x60] sm:$0xff] (%p53_p5) }
  0x16   : > { %205 = vst [vmem:[%s139_s30 + $0x10] sm:$0xff] %v204_v2  ;;  %v210_v5 = vld [vmem:[%s705_s29 + $0x78] sm:$0xff]  ;;  %207 = vst [vmem:[%s139_s30 + $0x18] sm:$0xff] %v206_v3  ;;  %v212_v6 = vld [vmem:[%s705_s29 + $0x90] sm:$0xff] }
  0x17   : > { %209 = vst [vmem:[%s139_s30 + $0x20] sm:$0xff] %v208_v4  ;;  %211 = vst [vmem:[%s139_s30 + $0x28] sm:$0xff] %v210_v5  ;;  %v214_v7 = vld [vmem:[%s705_s29 + $0xa8] sm:$0xff]  ;;  %v216_v8 = vld [vmem:[%s705_s29 + $0xc0] sm:$0xff] }
  0x18   : > { %213 = vst [vmem:[%s139_s30 + $0x30] sm:$0xff] %v212_v6  ;;  %215 = vst [vmem:[%s139_s30 + $0x38] sm:$0xff] %v214_v7  ;;  %v218_v9 = vld [vmem:[%s705_s29 + $0xd8] sm:$0xff]  ;;  %v220_v10 = vld [vmem:[%s705_s29 + $0xf0] sm:$0xff] }
  0x19   : > { %217 = vst [vmem:[%s139_s30 + $0x40] sm:$0xff] %v216_v8  ;;  %v222_v11 = vld [vmem:[%s705_s29 + $0x108] sm:$0xff]  ;;  %219 = vst [vmem:[%s139_s30 + $0x48] sm:$0xff] %v218_v9  ;;  %v224_v12 = vld [vmem:[%s705_s29 + $0x120] sm:$0xff] }
  0x1a   : > { %221 = vst [vmem:[%s139_s30 + $0x50] sm:$0xff] %v220_v10  ;;  %223 = vst [vmem:[%s139_s30 + $0x58] sm:$0xff] %v222_v11  ;;  %v226_v13 = vld [vmem:[%s705_s29 + $0x138] sm:$0xff]  ;;  %v228_v14 = vld [vmem:[%s705_s29 + $0x150] sm:$0xff] }
  0x1b   : > { %225 = vst [vmem:[%s139_s30 + $0x60] sm:$0xff] %v224_v12  ;;  %227 = vst [vmem:[%s139_s30 + $0x68] sm:$0xff] %v226_v13  ;;  %v230_v15 = vld [vmem:[%s705_s29 + $0x168] sm:$0xff] }
  0x1c   : > { %229 = vst [vmem:[%s139_s30 + $0x70] sm:$0xff] %v228_v14  ;;  %231 = vst [vmem:[%s139_s30 + $0x78] sm:$0xff] %v230_v15 }
  0x1d PF: > { %p466_p10 = scmp.ge.s32.totalorder %s627_s15, 1  ;;  %p242_p11 = scmp.lt.s32.totalorder %s627_s15, 4 }
  0x1f   : > { %p243_p12 = pnand %p466_p10, %p242_p11 }
  0x20   : > { %s726_s4 = sand.u32 (!%p243_p12), 1, %s619_s13   ;;  %p275_p13 = scmp.lt.s32.totalorder (!%p243_p12), %s673_s16, 2 }
  0x21   : > { %246 = sbr.rel (%p243_p12) target bundleno = 279 (0x117), region = 66  ;;  %s467_s5 = sshll.u32 (!%p243_p12), %s726_s4, 7 }
  0x22   : > { %s729_s6 = scalar_lea.vmem (!%p243_p12), [#allocation2], %s467_s5  ;;  %s468_s10 = sshll.u32 (!%p243_p12), %s726_s4, 3 }
  0x23   : > { %s471_s20 = sshll.u32 (!%p243_p12), %s673_s16, 7  ;;  %s274_s24 = scalar_lea.vmem (!%p243_p12), [#allocation3], %s468_s10 }
  0x24   : > { %s387_s25 = sshll.u32 (!%p243_p12), %s274_s24, 4  ;;  %s760_s28 = scalar_lea.hbm (!%p243_p12), %s799_s3, %s471_s20  ;;  %s388_s25 = int_to_ptr.vmem [resolvable:$true] %s387_s25 }
  0x25   : > { %s374_s29 = scalar_lea.sflag (!%p243_p12), [#allocation4], %s726_s4  ;;  %s567_s30 = scalar_lea.vmem (!%p243_p12), %s388_s25, 128 }
  0x26   : > { %v629_v16 = vmov 0.0   ;;  %vm630_vm0 = vmmov 0   ;;  %v294_v17 = vld [vmem:[%s729_s6 + $0x78] sm:$0xff]  ;;  %v293_v18 = vld [vmem:[%s729_s6 + $0x70] sm:$0xff]  ;;  %v292_v19 = vld [vmem:[%s729_s6 + $0x68] sm:$0xff]  ;;  %s276_s9 = scalar_select %p275_p13, %s673_s16, 2 }
  0x27   : > { %491 = vmatprep.subr.mxu0 %v629_v16  ;;  %523 = vmatprep.mubr.msk.f32.mxu0 %vm630_vm0, %v629_v16  ;;  %v291_v20 = vld [vmem:[%s729_s6 + $0x60] sm:$0xff]  ;;  %v290_v21 = vld [vmem:[%s729_s6 + $0x58] sm:$0xff]  ;;  %v289_v22 = vld [vmem:[%s729_s6 + $0x50] sm:$0xff]  ;;  %p568_p0 = scmp.ne.s32.totalorder %s388_s25, %s567_s30  ;;  %s631_s5 = smov [#allocation3]  }
  0x28   : > { %492 = vmatpush3.msra.mxu0 %v294_v17  ;;  %v288_v23 = vld [vmem:[%s729_s6 + $0x48] sm:$0xff]  ;;  %v287_v24 = vld [vmem:[%s729_s6 + $0x40] sm:$0xff]  ;;  %v286_v25 = vld [vmem:[%s729_s6 + $0x38] sm:$0xff]  ;;  %s277_s19 = scalar_lea.vmem %s798_s2, %s276_s9  ;;  %s571_s16 = sshll.u32 %s631_s5, 4  ;;  %s572_s16 = int_to_ptr.vmem [resolvable:$false] %s571_s16 }
  0x29   : > { %493 = vmatprep.subr.mxu0 %v629_v16  ;;  %v285_v26 = vld [vmem:[%s729_s6 + $0x30] sm:$0xff]  ;;  %v284_v27 = vld [vmem:[%s729_s6 + $0x28] sm:$0xff]  ;;  %v283_v28 = vld [vmem:[%s729_s6 + $0x20] sm:$0xff]  ;;  %p569_p1 = pnand %p568_p0, %p691_p6  ;;  %p574_p3 = scmp.lt.s32.totalorder %s388_s25, %s572_s16 }
  0x2a   : > { %494 = vmatpush3.msra.mxu0 %v293_v18  ;;  %v282_v29 = vld [vmem:[%s729_s6 + $0x18] sm:$0xff]  ;;  %v281_v30 = vld [vmem:[%s729_s6 + $0x10] sm:$0xff]  ;;  %v280_v31 = vld [vmem:[%s729_s6 + $0x8] sm:$0xff] }
  0x2b   : > { %495 = vmatprep.subr.mxu0 %v629_v16  ;;  %v279_v32 = vld [vmem:[%s729_s6] sm:$0xff]  ;;  %p570_p2 = pneg %p569_p1  ;;  %s573_s6 = scalar_lea.vmem %s572_s16, 256 }
  0x2c   : > { %496 = vmatpush3.msra.mxu0 %v292_v19  ;;  %v278_v33 = vld [vmem:[%s796_s0] sm:$0xff]  ;;  %p575_p4 = scmp.lt.s32.totalorder %s573_s6, %s567_s30 }
  0x2d   : > { %497 = vmatprep.subr.mxu0 %v629_v16  ;;  %v469_v34 = vld [vmem:[%s277_s19] ss:$0 sm:$0xff] }
  0x2e   : > { %498 = vmatpush3.msra.mxu0 %v291_v20  ;;  %p576_p5 = por %p575_p4, %p574_p3 }
  0x2f   : > { %499 = vmatprep.subr.mxu0 %v629_v16 }
  0x30   : > { %500 = vmatpush3.msra.mxu0 %v290_v21  ;;  %p577_p7 = pnand %p576_p5, %p570_p2 }
  0x31   : > { %501 = vmatprep.subr.mxu0 %v629_v16 }
  0x32   : > { %502 = vmatpush3.msra.mxu0 %v289_v22 }
  0x33   : > { %503 = vmatprep.subr.mxu0 %v629_v16 }
  0x34   : > { %504 = vmatpush3.msra.mxu0 %v288_v23 }
  0x35   : > { %505 = vmatprep.subr.mxu0 %v629_v16 }
  0x36   : > { %506 = vmatpush3.msra.mxu0 %v287_v24 }
  0x37   : > { %507 = vmatprep.subr.mxu0 %v629_v16 }
  0x38   : > { %508 = vmatpush3.msra.mxu0 %v286_v25 }
  0x39   : > { %509 = vmatprep.subr.mxu0 %v629_v16 }
  0x3a   : > { %510 = vmatpush3.msra.mxu0 %v285_v26 }
  0x3b   : > { %511 = vmatprep.subr.mxu0 %v629_v16 }
  0x3c   : > { %512 = vmatpush3.msra.mxu0 %v284_v27 }
  0x3d   : > { %513 = vmatprep.subr.mxu0 %v629_v16 }
  0x3e   : > { %514 = vmatpush3.msra.mxu0 %v283_v28 }
  0x3f   : > { %515 = vmatprep.subr.mxu0 %v629_v16 }
  0x40   : > { %516 = vmatpush3.msra.mxu0 %v282_v29 }
  0x41   : > { %517 = vmatprep.subr.mxu0 %v629_v16 }
  0x42   : > { %518 = vmatpush3.msra.mxu0 %v281_v30 }
  0x43   : > { %519 = vmatprep.subr.mxu0 %v629_v16 }
  0x44   : > { %520 = vmatpush3.msra.mxu0 %v280_v31 }
  0x45   : > { %521 = vmatprep.subr.mxu0 %v629_v16 }
  0x46   : > { %522 = vmatpush3.msra.mxu0 %v279_v32 }
  0x47   : > { %524 = vmatmul.mubr.f32.vlgmr.msra.gmra.mxu0 %v278_v33 }
 0x107   : > { %v368_v35 = vpop.f32.mrf.mxu0 }
 0x108   : > { %v369_v36 = vadd.f32 %v469_v34, %v368_v35 }
 0x109   : > { %v525_v37 = vpop.f32.mrf.mxu0 }
 0x10a   : > { %372 = vst [vmem:[%s274_s24] sm:$0xff] %v369_v36 }
 0x10b   : > { %580 = shalt.err (!%p577_p7)
}
 0x10c   : > { %s581_s7 = scalar_lea.hbm %s760_s28, 128  ;;  %s585_s9 = scalar_lea.hbm %s799_s3, 384 }
 0x10d   : > { %p582_p9 = scmp.ne.s32.totalorder %s760_s28, %s581_s7  ;;  %p586_p12 = scmp.lt.s32.totalorder %s760_s28, %s799_s3 }
 0x10e   : > { %p587_p13 = scmp.lt.s32.totalorder %s585_s9, %s581_s7 }
 0x10f   : > { %p583_p10 = pnand %p582_p9, %p691_p6 }
 0x110   : > { %p588_p0 = por %p587_p13, %p586_p12 }
 0x111   : > { %p584_p11 = pneg %p583_p10 }
 0x113   : > { %p589_p1 = pnand %p588_p0, %p584_p11 }
 0x115   : > { %592 = shalt.err (!%p589_p1)
}
 0x116   : > { %526 = dma.vmem_to_hbm [thread:$0]  (%p691_p6), %s388_s25, 128, %s760_s28, %s374_s29  }
 0x117 PF: > { %p532_p2 = scmp.ge.s32.totalorder %s627_s15, 2  ;;  %s399_s17 = sand.u32 1, %s615_s12  }
 0x118   : > { %s400_s19 = scalar_lea.sflag [#allocation4], %s399_s17 }
 0x119   : > { %p529_p3 = pnand %p532_p2, %p695_p8 }
 0x11b   : > { %p530_p4 = pneg %p529_p3 }
 0x11d   : > { %610 = dma.done.wait (%p530_p4), %s400_s19, 128  }
 0x11e   : > { %612 = vsyncadd (%p530_p4), %s400_s19, 4294967168  ;;  %p13_p5 = scmp.ge.s32.totalorder %s677_s18, 5   ;;  %s802_s12 = smov %s619_s13 }
 0x11f   : > { %s803_s13 = smov %s623_s14  ;;  %s804_s14 = smov %s689_s21 }
 0x120   : > { %s805_s15 = smov %s677_s18  ;;  %15 = sbr.rel (!%p13_p5) target bundleno = 3 (0x3), region = 113 }
 0x125   :  { %405 = vsyncpa [#allocation4], 1 }
 0x126   :  { %407 = vsyncpa [#allocation4 + $0x1], 1 }

// kernel: autoencoder_forward.2
= control target key start
LH: loop header
LB: loop body
LE: loop exit
PB: predicated region body
PF: predicated region fallthrough
CT: control target
= control target key end

     0   :  { %12 = vsyncpa [#allocation4], 0  ;;  %s1584_s0 = inlined_call_operand.hbm [shape: f32[8,384], index: 0, kind: input, shape index: {}]   ;;  %s1585_s1 = inlined_call_operand.hbm [shape: f32[384,128], index: 1, kind: input, shape index: {}]   ;;  %s1586_s2 = inlined_call_operand.vmem [shape: f32[8,128], index: 2, kind: input, shape index: {}]   ;;  %s1587_s3 = inlined_call_operand.hbm [shape: f32[128,128], index: 3, kind: input, shape index: {}]   ;;  %s1588_s4 = inlined_call_operand.hbm [shape: f32[128,128], index: 4, kind: input, shape index: {}]   ;;  %s1589_s5 = inlined_call_operand.hbm [shape: f32[8,128], index: 5, kind: output, shape index: {0}]   ;;  %s1590_s6 = inlined_call_operand.vmem [shape: f32[8,128], index: 6, kind: output, shape index: {1}]  }
   0x1   :  { %14 = vsyncpa [#allocation4 + $0x1], 0 }
   0x2   :  { %15 = vsyncpa [#allocation7], 0 }
   0x3   :  { %17 = vsyncpa [#allocation7 + $0x1], 0 }
   0x4   :  { %18 = vsyncpa [#allocation10], 0 }
   0x5   :  { %19 = vsyncpa [#allocation5], 0  ;;  %s1299_s21 = smov 0   ;;  %s1301_s22 = smov 0  }
   0x6   :  { %s1303_s23 = smov 0   ;;  %s1305_s24 = smov 0  }
   0x7 LB: > { %s1318_s25 = sadd.s32 4294967295, %s1250_s24   ;;  %p45_p0 = scmp.ne.s32.totalorder %s1242_s22, %s1238_s21  ;;  %s1250_s24 = sphi %s1305_s24, %s1609_s24   ;;  %s1246_s23 = sphi %s1303_s23, %s1608_s23   ;;  %s1242_s22 = sphi %s1301_s22, %s1607_s22   ;;  %s1238_s21 = sphi %s1299_s21, %s1606_s21  }
   0x8   : > { %p1591_p1 = scmp.eq.s32.totalorder %s1318_s25, 0  ;;  %p797_p2 = scmp.ge.s32.totalorder %s1250_s24, 1 }
   0x9   : > { %p187_p3 = scmp.lt.s32.totalorder %s1250_s24, 4  ;;  %s1252_s28 = smov [#allocation8]  }
   0xa   : > { %p1327_p5 = por %p1591_p1, %p45_p0  ;;  %s202_s29 = sshll.u32 %s1252_s28, 4  ;;  %s203_s29 = int_to_ptr.vmem [resolvable:$true] %s202_s29 }
   0xb   : > { %p1331_p6 = pnand %p797_p2, %p187_p3  ;;  %s1253_s7 = smov [#allocation9]  }
   0xc   : > { %s1594_s26 = scalar_select %p1327_p5, 1, 0 }
   0xd   : > { %s1595_s27 = scalar_select %p1331_p6, 1, 0 }
   0xe   : > { %p997_p7 = pneg %p1331_p6  ;;  %s215_s8 = sshll.u32 %s1253_s7, 4  ;;  %s216_s8 = int_to_ptr.vmem [resolvable:$true] %s215_s8 }
   0xf   : > { %s1079_s9 = scalar_lea.vmem %s203_s29, 2048  ;;  %p1087_p13 = scmp.lt.s32.totalorder %s203_s29, %s203_s29 }
  0x10   : > { %p1339_p8 = pnand %p997_p7, %p1591_p1  ;;  %p1080_p10 = scmp.ne.s32.totalorder %s203_s29, %s1079_s9 }
  0x11   : > { %p1088_p0 = scmp.lt.s32.totalorder %s1079_s9, %s1079_s9 }
  0x12   : > { %p1070_p9 = pneg %p1339_p8 }
  0x13   : > { %p1089_p2 = por %p1088_p0, %p1087_p13 }
  0x14   : > { %p1082_p11 = pnand %p1080_p10, %p1070_p9 }
  0x16   : > { %p1083_p12 = pneg %p1082_p11 }
  0x18   : > { %p1090_p3 = pnand %p1089_p2, %p1083_p12 }
  0x1a   : > { %1093 = shalt.err (!%p1090_p3)
}
  0x1b   : > { %s1254_s10 = smov 128   ;;  %s1255_s11 = smov 8  }
  0x1c   : > { %1000 = dma.hbm_to_vmem [thread:$0]  (!%p1339_p8), %s1587_s3, 2048, %s203_s29, [#allocation7], %s1254_s10, %s1254_s10, %s1255_s11  }
  0x1d   : > { %s1105_s14 = scalar_lea.vmem %s216_s8, 2048  ;;  %p1113_p12 = scmp.lt.s32.totalorder %s216_s8, %s216_s8 }
  0x1e   : > { %p1106_p7 = scmp.ne.s32.totalorder %s216_s8, %s1105_s14  ;;  %p1114_p13 = scmp.lt.s32.totalorder %s1105_s14, %s1105_s14 }
  0x20   : > { %p1108_p10 = pnand %p1106_p7, %p1070_p9  ;;  %p1115_p0 = por %p1114_p13, %p1113_p12 }
  0x22   : > { %p1109_p11 = pneg %p1108_p10 }
  0x24   : > { %p1116_p2 = pnand %p1115_p0, %p1109_p11 }
  0x26   : > { %1119 = shalt.err (!%p1116_p2)
}
  0x27   : > { %1003 = dma.hbm_to_vmem [thread:$0]  (!%p1339_p8), %s1588_s4, 2048, %s216_s8, [#allocation10], %s1254_s10, %s1254_s10, %s1255_s11  }
  0x28   : > { %s1368_s17 = sadd.s32 1, %s1250_s24   ;;  %s32_s18 = sadd.s32 1, %s1246_s23 }
  0x29   : > { %s29_s19 = ssub.s32 %s1250_s24, %s1368_s17  ;;  %p39_p9 = scmp.ne.s32.totalorder %s1246_s23, %s1242_s22 }
  0x2a   : > { %p30_p3 = scmp.eq.s32.totalorder %s29_s19, 0  ;;  %p40_p7 = scmp.eq.s32.totalorder %s1250_s24, 0 }
  0x2b   : > { %p1013_p10 = scmp.lt.s32.totalorder %s1250_s24, 3  ;;  %s1378_s20 = sand.u32 1, %s1246_s23  }
  0x2c   : > { %s1381_s21 = scalar_select %p30_p3, %s1246_s23, %s32_s18  }
  0x2d   : > { %p41_p11 = por %p40_p7, %p39_p9  ;;  %s801_s28 = sshll.u32 %s1378_s20, 3 }
  0x2e   : > { %s802_s29 = sshll.u32 %s1250_s24, 7  ;;  %s233_s9 = scalar_lea.vmem [#allocation3], %s801_s28 }
  0x2f   : > { %s1388_s8 = scalar_lea.hbm %s1584_s0, %s802_s29  ;;  %s240_s12 = sshll.u32 %s233_s9, 4  ;;  %s241_s12 = int_to_ptr.vmem [resolvable:$true] %s240_s12 }
  0x30   : > { %p1390_p8 = pnand %p1013_p10, %p41_p11  ;;  %s803_s14 = sshll.u32 %s1378_s20, 7 }
  0x31   : > { %s230_s15 = scalar_lea.sflag [#allocation4], %s1378_s20  ;;  %s1120_s16 = scalar_lea.hbm %s1388_s8, 128 }
  0x32   : > { %p1121_p12 = scmp.ne.s32.totalorder %s1388_s8, %s1120_s16  ;;  %p1122_p13 = pneg %p1390_p8 }
  0x33   : > { %s1125_s28 = scalar_lea.hbm %s1584_s0, 384  ;;  %p1126_p9 = scmp.lt.s32.totalorder %s1388_s8, %s1584_s0 }
  0x34   : > { %p1123_p0 = pnand %p1122_p13, %p1121_p12  ;;  %p1127_p3 = scmp.lt.s32.totalorder %s1125_s28, %s1120_s16 }
  0x36   : > { %p1124_p2 = pneg %p1123_p0  ;;  %p1128_p7 = por %p1127_p3, %p1126_p9 }
  0x38   : > { %p1129_p10 = pnand %p1128_p7, %p1124_p2 }
  0x3a   : > { %1132 = shalt.err (!%p1129_p10)
}
  0x3b   : > { %s1133_s20 = scalar_lea.vmem %s241_s12, 128  ;;  %s1256_s7 = smov [#allocation3]  }
  0x3c   : > { %p1134_p11 = scmp.ne.s32.totalorder %s241_s12, %s1133_s20  ;;  %s1138_s9 = sshll.u32 %s1256_s7, 4  ;;  %s1139_s9 = int_to_ptr.vmem [resolvable:$false] %s1138_s9 }
  0x3d   : > { %s1140_s18 = scalar_lea.vmem %s1139_s9, 256  ;;  %p1141_p0 = scmp.lt.s32.totalorder %s241_s12, %s1139_s9 }
  0x3e   : > { %p1136_p4 = pnand %p1134_p11, %p1122_p13  ;;  %p1142_p1 = scmp.lt.s32.totalorder %s1140_s18, %s1133_s20 }
  0x40   : > { %p1137_p12 = pneg %p1136_p4  ;;  %p1143_p5 = por %p1142_p1, %p1141_p0 }
  0x42   : > { %p1144_p6 = pnand %p1143_p5, %p1137_p12 }
  0x44   : > { %1147 = shalt.err (!%p1144_p6)
}
  0x45   : > { %1007 = dma.hbm_to_vmem [thread:$0]  (!%p1390_p8), %s1388_s8, 128, %s241_s12, %s230_s15  }
  0x46   : > { %s251_s16 = scalar_lea.vmem [#allocation6], %s803_s14  ;;  %s247_s28 = sand.u32 1, %s1250_s24  }
  0x47   : > { %s258_s19 = sshll.u32 %s251_s16, 4  ;;  %s824_s29 = sshll.u32 %s1250_s24, 11  ;;  %s1417_s19 = int_to_ptr.vmem [resolvable:$true] %s258_s19 }
  0x48   : > { %s1423_s20 = scalar_lea.hbm %s1585_s1, %s824_s29  ;;  %s248_s9 = scalar_lea.sflag [#allocation7], %s247_s28 }
  0x49   : > { %s1148_s18 = scalar_lea.hbm %s1423_s20, 2048  ;;  %s1153_s14 = scalar_lea.hbm %s1585_s1, 6144 }
  0x4a   : > { %p1149_p1 = scmp.ne.s32.totalorder %s1423_s20, %s1148_s18  ;;  %p1154_p6 = scmp.lt.s32.totalorder %s1423_s20, %s1585_s1 }
  0x4b   : > { %p1155_p2 = scmp.lt.s32.totalorder %s1153_s14, %s1148_s18 }
  0x4c   : > { %p1151_p4 = pnand %p1149_p1, %p1122_p13 }
  0x4d   : > { %p1156_p9 = por %p1155_p2, %p1154_p6 }
  0x4e   : > { %p1152_p5 = pneg %p1151_p4 }
  0x50   : > { %p1157_p3 = pnand %p1156_p9, %p1152_p5 }
  0x52   : > { %1160 = shalt.err (!%p1157_p3)
}
  0x53   : > { %s1161_s16 = scalar_lea.vmem %s1417_s19, 2048  ;;  %s1257_s28 = smov [#allocation6]  }
  0x54   : > { %p1162_p7 = scmp.ne.s32.totalorder %s1417_s19, %s1161_s16  ;;  %s1166_s29 = sshll.u32 %s1257_s28, 4  ;;  %s1167_s29 = int_to_ptr.vmem [resolvable:$false] %s1166_s29 }
  0x55   : > { %s1168_s30 = scalar_lea.vmem %s1167_s29, 4096  ;;  %p1169_p12 = scmp.lt.s32.totalorder %s1417_s19, %s1167_s29 }
  0x56   : > { %p1164_p10 = pnand %p1162_p7, %p1122_p13  ;;  %p1170_p0 = scmp.lt.s32.totalorder %s1168_s30, %s1161_s16 }
  0x58   : > { %p1165_p11 = pneg %p1164_p10  ;;  %p1171_p1 = por %p1170_p0, %p1169_p12 }
  0x5a   : > { %p1172_p4 = pnand %p1171_p1, %p1165_p11 }
  0x5c   : > { %1175 = shalt.err (!%p1172_p4)
}
  0x5d   : > { %1010 = dma.hbm_to_vmem [thread:$0]  (!%p1390_p8), %s1423_s20, 2048, %s1417_s19, %s248_s9, %s1254_s10, %s1254_s10, %s1255_s11  }
  0x5e   : > { %p1598_p13 = scmp.ne.s32.totalorder %s1595_s27, 0 }
  0x5f   : > { %s272_s7 = sand.u32 (!%p1598_p13), 1, %s1242_s22   ;;  %p1599_p5 = scmp.ne.s32.totalorder (!%p1598_p13), %s1594_s26, 0 }
  0x60   : > { %270 = sbr.rel (%p1598_p13) target bundleno = 889 (0x379), region = 40  ;;  %s807_s18 = sshll.u32 (!%p1598_p13), %s272_s7, 3 }
  0x61   : > { %s273_s8 = scalar_lea.sflag (!%p1598_p13), [#allocation4], %s272_s7  ;;  %s1453_s12 = scalar_lea.vmem (!%p1598_p13), [#allocation3], %s807_s18 }
  0x65   : > { %1217 = dma.done.wait (%p1599_p5), %s273_s8, 128  }
  0x66   : > { %1219 = vsyncadd (%p1599_p5), %s273_s8, 4294967168  ;;  %s281_s13 = sand.u32 1, %s1318_s25   ;;  %s808_s14 = sshll.u32 %s272_s7, 7 }
  0x67   : > { %s282_s10 = scalar_lea.sflag [#allocation7], %s281_s13  ;;  %s1460_s11 = scalar_lea.vmem [#allocation6], %s808_s14 }
  0x68   : > { %1221 = dma.done.wait (%p1599_p5), %s282_s10, 2048  }
  0x69   : > { %1223 = vsyncadd (%p1599_p5), %s282_s10, 4294965248  ;;  %p1600_p8 = scmp.eq.s32.totalorder %s1318_s25, 0 }
  0x6b   : > { %1225 = dma.done.wait (%p1600_p8), [#allocation7], 2048   ;;  %p1601_p6 = pmov %p1600_p8 }
  0x6d   : > { %1227 = vsyncadd (%p1601_p6), [#allocation7], 4294965248  ;;  %p1602_p2 = pmov %p1601_p6 }
  0x6f   : > { %1229 = dma.done.wait (%p1602_p2), [#allocation10], 2048   ;;  %p1603_p9 = pmov %p1602_p2 }
  0x70   : > { %p1604_p3 = scmp.ne.s32.totalorder %s1318_s25, 0 }
  0x71   : > { %1231 = vsyncadd (%p1603_p9), [#allocation10], 4294965248 }
  0x72   : > { %326 = sbr.rel (%p1604_p3) target bundleno = 121 (0x79), region = 60 }
  0x77   : > { %v1258_v0 = vmov 0.0  }
  0x78   : > { %327 = vst [vmem:[#allocation2] sm:$0xff] %v1258_v0 }
  0x79 PF: > { %v345_v1 = vld [vmem:[%s1460_s11 + $0x78] sm:$0xff]  ;;  %v1259_v2 = vmov 0.0   ;;  %v344_v3 = vld [vmem:[%s1460_s11 + $0x70] sm:$0xff]  ;;  %vm1260_vm0 = vmmov 0   ;;  %v343_v4 = vld [vmem:[%s1460_s11 + $0x68] sm:$0xff]  ;;  %p812_p7 = scmp.ne.s32.totalorder %s1318_s25, 2 }
  0x7a   : > { %876 = vmatprep.subr.mxu0 %v1259_v2  ;;  %908 = vmatprep.mubr.msk.f32.mxu0 %vm1260_vm0, %v1259_v2  ;;  %v342_v5 = vld [vmem:[%s1460_s11 + $0x60] sm:$0xff]  ;;  %v341_v6 = vld [vmem:[%s1460_s11 + $0x58] sm:$0xff]  ;;  %v340_v7 = vld [vmem:[%s1460_s11 + $0x50] sm:$0xff] }
  0x7b   : > { %877 = vmatpush3.msra.mxu0 %v345_v1  ;;  %v339_v8 = vld [vmem:[%s1460_s11 + $0x48] sm:$0xff]  ;;  %v338_v9 = vld [vmem:[%s1460_s11 + $0x40] sm:$0xff]  ;;  %v337_v10 = vld [vmem:[%s1460_s11 + $0x38] sm:$0xff] }
  0x7c   : > { %878 = vmatprep.subr.mxu0 %v1259_v2  ;;  %v336_v11 = vld [vmem:[%s1460_s11 + $0x30] sm:$0xff]  ;;  %v335_v12 = vld [vmem:[%s1460_s11 + $0x28] sm:$0xff]  ;;  %v334_v13 = vld [vmem:[%s1460_s11 + $0x20] sm:$0xff] }
  0x7d   : > { %879 = vmatpush3.msra.mxu0 %v344_v3  ;;  %v333_v14 = vld [vmem:[%s1460_s11 + $0x18] sm:$0xff]  ;;  %v332_v15 = vld [vmem:[%s1460_s11 + $0x10] sm:$0xff]  ;;  %v331_v16 = vld [vmem:[%s1460_s11 + $0x8] sm:$0xff] }
  0x7e   : > { %880 = vmatprep.subr.mxu0 %v1259_v2  ;;  %v330_v17 = vld [vmem:[%s1460_s11] sm:$0xff]  ;;  %v329_v18 = vld [vmem:[%s1453_s12] sm:$0xff] }
  0x7f   : > { %881 = vmatpush3.msra.mxu0 %v343_v4  ;;  %v328_v19 = vld [vmem:[#allocation2] sm:$0xff] }
  0x80   : > { %882 = vmatprep.subr.mxu0 %v1259_v2 }
  0x81   : > { %883 = vmatpush3.msra.mxu0 %v342_v5 }
  0x82   : > { %884 = vmatprep.subr.mxu0 %v1259_v2 }
  0x83   : > { %885 = vmatpush3.msra.mxu0 %v341_v6 }
  0x84   : > { %886 = vmatprep.subr.mxu0 %v1259_v2 }
  0x85   : > { %887 = vmatpush3.msra.mxu0 %v340_v7 }
  0x86   : > { %888 = vmatprep.subr.mxu0 %v1259_v2 }
  0x87   : > { %889 = vmatpush3.msra.mxu0 %v339_v8 }
  0x88   : > { %890 = vmatprep.subr.mxu0 %v1259_v2 }
  0x89   : > { %891 = vmatpush3.msra.mxu0 %v338_v9 }
  0x8a   : > { %892 = vmatprep.subr.mxu0 %v1259_v2 }
  0x8b   : > { %893 = vmatpush3.msra.mxu0 %v337_v10 }
  0x8c   : > { %894 = vmatprep.subr.mxu0 %v1259_v2 }
  0x8d   : > { %895 = vmatpush3.msra.mxu0 %v336_v11 }
  0x8e   : > { %896 = vmatprep.subr.mxu0 %v1259_v2 }
  0x8f   : > { %897 = vmatpush3.msra.mxu0 %v335_v12 }
  0x90   : > { %898 = vmatprep.subr.mxu0 %v1259_v2 }
  0x91   : > { %899 = vmatpush3.msra.mxu0 %v334_v13 }
  0x92   : > { %900 = vmatprep.subr.mxu0 %v1259_v2 }
  0x93   : > { %901 = vmatpush3.msra.mxu0 %v333_v14 }
  0x94   : > { %902 = vmatprep.subr.mxu0 %v1259_v2 }
  0x95   : > { %903 = vmatpush3.msra.mxu0 %v332_v15 }
  0x96   : > { %904 = vmatprep.subr.mxu0 %v1259_v2 }
  0x97   : > { %905 = vmatpush3.msra.mxu0 %v331_v16 }
  0x98   : > { %906 = vmatprep.subr.mxu0 %v1259_v2 }
  0x99   : > { %907 = vmatpush3.msra.mxu0 %v330_v17 }
  0x9a   : > { %909 = vmatmul.mubr.f32.vlgmr.msra.gmra.mxu0 %v329_v18 }
 0x159   : > { %421 = sbr.rel (%p812_p7) target bundleno = 874 (0x36a), region = 64 }
 0x15a   : > { %v412_v20 = vpop.f32.mrf.mxu0 }
 0x15b   : > { %v416_v21 = vadd.f32 %v412_v20, %v328_v19 }
 0x15c   : > { %v910_v22 = vpop.f32.mrf.mxu0 }
 0x15d   : > { %417 = vst [vmem:[#allocation2] sm:$0xff] %v416_v21 }
 0x15e   : > { %v487_v23 = vld [vmem:[#allocation8 + $0x78] sm:$0xff]  ;;  %v1261_v24 = vmov 0.0   ;;  %v486_v25 = vld [vmem:[#allocation8 + $0x70] sm:$0xff]  ;;  %vm1262_vm1 = vmmov 0   ;;  %v485_v26 = vld [vmem:[#allocation8 + $0x68] sm:$0xff] }
 0x15f   : > { %911 = vmatprep.subr.mxu0 %v1261_v24  ;;  %943 = vmatprep.mubr.msk.f32.mxu0 %vm1262_vm1, %v1261_v24  ;;  %v484_v27 = vld [vmem:[#allocation8 + $0x60] sm:$0xff]  ;;  %v813_v28 = vld [vmem:[%s1586_s2] ss:$0 sm:$0xff]  ;;  %v578_v30 = vld [vmem:[#allocation9 + $0x78] sm:$0xff] }
 0x160   : > { %912 = vmatpush3.msra.mxu0 %v487_v23  ;;  %946 = vmatprep.subr.mxu1 %v1261_v24  ;;  %v483_v31 = vld [vmem:[#allocation8 + $0x58] sm:$0xff]  ;;  %v577_v33 = vld [vmem:[#allocation9 + $0x70] sm:$0xff]  ;;  %v576_v34 = vld [vmem:[#allocation9 + $0x68] sm:$0xff] }
 0x161   : > { %913 = vmatprep.subr.mxu0 %v1261_v24  ;;  %978 = vmatprep.mubr.msk.f32.mxu1 %vm1262_vm1, %v1261_v24  ;;  %v482_v35 = vld [vmem:[#allocation8 + $0x50] sm:$0xff]  ;;  %v575_v38 = vld [vmem:[#allocation9 + $0x60] sm:$0xff]  ;;  %v481_v39 = vld [vmem:[#allocation8 + $0x48] sm:$0xff] }
 0x162   : > { %914 = vmatpush3.msra.mxu0 %v486_v25  ;;  %947 = vmatpush3.msra.mxu1 %v578_v30  ;;  %v574_v42 = vld [vmem:[#allocation9 + $0x58] sm:$0xff]  ;;  %v480_v43 = vld [vmem:[#allocation8 + $0x40] sm:$0xff]  ;;  %v573_v46 = vld [vmem:[#allocation9 + $0x50] sm:$0xff] }
 0x163   : > { %915 = vmatprep.subr.mxu0 %v1261_v24  ;;  %948 = vmatprep.subr.mxu1 %v1261_v24  ;;  %v479_v47 = vld [vmem:[#allocation8 + $0x38] sm:$0xff]  ;;  %v572_v50 = vld [vmem:[#allocation9 + $0x48] sm:$0xff]  ;;  %v478_v51 = vld [vmem:[#allocation8 + $0x30] sm:$0xff] }
 0x164   : > { %916 = vmatpush3.msra.mxu0 %v485_v26  ;;  %v429_v29 = vld [vmem:[#allocation2] sm:$0xff]  ;;  %949 = vmatpush3.msra.mxu1 %v577_v33  ;;  %v571_v54 = vld [vmem:[#allocation9 + $0x40] sm:$0xff]  ;;  %v570_v58 = vld [vmem:[#allocation9 + $0x38] sm:$0xff] }
 0x165   : > { %917 = vmatprep.subr.mxu0 %v1261_v24  ;;  %v1504_v32 = vadd.f32 %v813_v28, %v429_v29  ;;  %950 = vmatprep.subr.mxu1 %v1261_v24  ;;  %v477_v55 = vld [vmem:[#allocation8 + $0x28] sm:$0xff]  ;;  %v476_v59 = vld [vmem:[#allocation8 + $0x20] sm:$0xff]  ;;  %v569_v62 = vld [vmem:[#allocation9 + $0x30] sm:$0xff] }
 0x166   : > { %918 = vmatpush3.msra.mxu0 %v484_v27  ;;  %951 = vmatpush3.msra.mxu1 %v576_v34  ;;  %v475_v63 = vld [vmem:[#allocation8 + $0x18] sm:$0xff]  ;;  %v568_v2 = vld [vmem:[#allocation9 + $0x28] sm:$0xff]  ;;  %v474_v3 = vld [vmem:[#allocation8 + $0x10] sm:$0xff] }
 0x167   : > { %919 = vmatprep.subr.mxu0 %v1261_v24  ;;  %v435_v36 = vrot.slane %v1504_v32, 4  ;;  %v441_v37 = vmul.f32 %v1504_v32, %v1504_v32  ;;  %952 = vmatprep.subr.mxu1 %v1261_v24  ;;  %v567_v5 = vld [vmem:[#allocation9 + $0x20] sm:$0xff]  ;;  %v473_v6 = vld [vmem:[#allocation8 + $0x8] sm:$0xff]  ;;  %v566_v8 = vld [vmem:[#allocation9 + $0x18] sm:$0xff] }
 0x168   : > { %920 = vmatpush3.msra.mxu0 %v483_v31  ;;  %953 = vmatpush3.msra.mxu1 %v575_v38  ;;  %v472_v9 = vld [vmem:[#allocation8] sm:$0xff]  ;;  %v565_v11 = vld [vmem:[#allocation9 + $0x10] sm:$0xff]  ;;  %v814_v14 = vld [vmem:[%s1586_s2 + $0x1] ss:$0 sm:$0xff] }
 0x169   : > { %921 = vmatprep.subr.mxu0 %v1261_v24  ;;  %v436_v40 = vadd.f32 %v435_v36, %v1504_v32  ;;  %v442_v41 = vrot.slane %v441_v37, 4  ;;  %954 = vmatprep.subr.mxu1 %v1261_v24  ;;  %v815_v16 = vld [vmem:[%s1586_s2 + $0x2] ss:$0 sm:$0xff]  ;;  %v563_v26 = vld [vmem:[#allocation9] sm:$0xff]  ;;  %v816_v27 = vld [vmem:[%s1586_s2 + $0x3] ss:$0 sm:$0xff] }
 0x16a   : > { %922 = vmatpush3.msra.mxu0 %v482_v35  ;;  %955 = vmatpush3.msra.mxu1 %v574_v42  ;;  %v564_v25 = vld [vmem:[#allocation9 + $0x8] sm:$0xff] }
 0x16b   : > { %923 = vmatprep.subr.mxu0 %v1261_v24  ;;  %v437_v44 = vrot.slane %v436_v40, 2  ;;  %v443_v45 = vadd.f32 %v442_v41, %v441_v37  ;;  %956 = vmatprep.subr.mxu1 %v1261_v24  ;;  %v817_v31 = vld [vmem:[%s1586_s2 + $0x4] ss:$0 sm:$0xff] }
 0x16c   : > { %924 = vmatpush3.msra.mxu0 %v481_v39  ;;  %957 = vmatpush3.msra.mxu1 %v573_v46 }
 0x16d   : > { %925 = vmatprep.subr.mxu0 %v1261_v24  ;;  %v438_v48 = vadd.f32 %v437_v44, %v436_v40  ;;  %v444_v49 = vrot.slane %v443_v45, 2  ;;  %958 = vmatprep.subr.mxu1 %v1261_v24 }
 0x16e   : > { %926 = vmatpush3.msra.mxu0 %v480_v43  ;;  %959 = vmatpush3.msra.mxu1 %v572_v50 }
 0x16f   : > { %927 = vmatprep.subr.mxu0 %v1261_v24  ;;  %v439_v52 = vrot.slane %v438_v48, 1  ;;  %v445_v53 = vadd.f32 %v444_v49, %v443_v45  ;;  %960 = vmatprep.subr.mxu1 %v1261_v24 }
 0x170   : > { %928 = vmatpush3.msra.mxu0 %v479_v47  ;;  %961 = vmatpush3.msra.mxu1 %v571_v54 }
 0x171   : > { %929 = vmatprep.subr.mxu0 %v1261_v24  ;;  %v440_v56 = vadd.f32 %v439_v52, %v438_v48  ;;  %v446_v57 = vrot.slane %v445_v53, 1  ;;  %962 = vmatprep.subr.mxu1 %v1261_v24 }
 0x172   : > { %930 = vmatpush3.msra.mxu0 %v478_v51  ;;  %963 = vmatpush3.msra.mxu1 %v570_v58 }
 0x173   : > { %931 = vmatprep.subr.mxu0 %v1261_v24  ;;  %v447_v60 = vadd.f32 %v446_v57, %v445_v53  ;;  %v448_v61 = vmul.f32 0.125, %v440_v56  ;;  %964 = vmatprep.subr.mxu1 %v1261_v24  ;;  %v819_v57 = vld [vmem:[%s1586_s2 + $0x6] ss:$0 sm:$0xff] }
 0x174   : > { %932 = vmatpush3.msra.mxu0 %v477_v55  ;;  %965 = vmatpush3.msra.mxu1 %v569_v62  ;;  %v818_v55 = vld [vmem:[%s1586_s2 + $0x5] ss:$0 sm:$0xff] }
 0x175   : > { %933 = vmatprep.subr.mxu0 %v1261_v24  ;;  %v449_v0 = vmul.f32 0.125, %v447_v60  ;;  %v450_v1 = vmul.f32 %v448_v61, %v448_v61  ;;  %966 = vmatprep.subr.mxu1 %v1261_v24  ;;  %v453_v12 = vsub.f32 %v1504_v32, %v448_v61 }
 0x176   : > { %934 = vmatpush3.msra.mxu0 %v476_v59  ;;  %967 = vmatpush3.msra.mxu1 %v568_v2 }
 0x177   : > { %935 = vmatprep.subr.mxu0 %v1261_v24  ;;  %v451_v4 = vsub.f32 %v449_v0, %v450_v1  ;;  %968 = vmatprep.subr.mxu1 %v1261_v24 }
 0x178   : > { %936 = vmatpush3.msra.mxu0 %v475_v63  ;;  %969 = vmatpush3.msra.mxu1 %v567_v5 }
 0x179   : > { %937 = vmatprep.subr.mxu0 %v1261_v24  ;;  %v452_v7 = vmax.f32 %v451_v4, 0.0  ;;  %970 = vmatprep.subr.mxu1 %v1261_v24 }
 0x17a   : > { %938 = vmatpush3.msra.mxu0 %v474_v3  ;;  %971 = vmatpush3.msra.mxu1 %v566_v8 }
 0x17b   : > { %939 = vmatprep.subr.mxu0 %v1261_v24  ;;  %v454_v10 = vadd.f32 1e-05, %v452_v7  ;;  %972 = vmatprep.subr.mxu1 %v1261_v24 }
 0x17c   : > { %940 = vmatpush3.msra.mxu0 %v473_v6  ;;  %973 = vmatpush3.msra.mxu1 %v565_v11 }
 0x17d   : > { %941 = vmatprep.subr.mxu0 %v1261_v24  ;;  %1060 = vrsqrt.f32 %v454_v10  ;;  %974 = vmatprep.subr.mxu1 %v1261_v24 }
 0x17e   : > { %942 = vmatpush3.msra.mxu0 %v472_v9  ;;  %975 = vmatpush3.msra.mxu1 %v564_v25 }
 0x17f   : > { %976 = vmatprep.subr.mxu1 %v1261_v24 }
 0x180   : > { %977 = vmatpush3.msra.mxu1 %v563_v26 }
 0x18a   : > { %v1061_v13 = vpop.eup %1060 }
 0x18b   : > { %v456_v15 = vmul.f32 %v1061_v13, %v453_v12 }
 0x18d   : > { %v461_v17 = vmul.f32 %v814_v14, %v456_v15 }
 0x18f   : > { %v466_v18 = vadd.f32 %v815_v16, %v461_v17 }
 0x191   : > { %v468_v19 = vmul.f32 0.70710677, %v466_v18  ;;  %v467_v20 = vmul.f32 0.5, %v466_v18 }
 0x193   : > { %1062 = verf.f32 %v468_v19 }
 0x1a0   : > { %v1063_v21 = vpop.eup %1062 }
 0x1a1   : > { %v470_v22 = vadd.f32 1.0, %v1063_v21 }
 0x1a3   : > { %v471_v23 = vmul.f32 %v470_v22, %v467_v20 }
 0x1a5   : > { %944 = vmatmul.mubr.f32.vlgmr.msra.gmra.mxu0 %v471_v23 }
 0x265   : > { %v558_v28 = vpop.f32.mrf.mxu0 }
 0x266   : > { %v559_v29 = vadd.f32 %v816_v27, %v558_v28 }
 0x267   : > { %v945_v30 = vpop.f32.mrf.mxu0 }
 0x268   : > { %562 = vst [vmem:[#allocation11] sm:$0xff] %v559_v29  ;;  %979 = vmatmul.mubr.f32.vlgmr.msra.gmra.mxu1 %v559_v29 }
 0x328   : > { %v649_v32 = vpop.f32.mrf.mxu1 }
 0x329   : > { %v650_v33 = vadd.f32 %v817_v31, %v649_v32 }
 0x32a   : > { %v980_v34 = vpop.f32.mrf.mxu1 }
 0x32b   : > { %v653_v35 = vrot.slane %v650_v33, 4  ;;  %v659_v24 = vmul.f32 %v650_v33, %v650_v33 }
 0x32d   : > { %v654_v36 = vadd.f32 %v653_v35, %v650_v33  ;;  %v660_v37 = vrot.slane %v659_v24, 4 }
 0x32f   : > { %v655_v38 = vrot.slane %v654_v36, 2  ;;  %v661_v39 = vadd.f32 %v660_v37, %v659_v24 }
 0x331   : > { %v656_v40 = vadd.f32 %v655_v38, %v654_v36  ;;  %v662_v41 = vrot.slane %v661_v39, 2 }
 0x333   : > { %v657_v42 = vrot.slane %v656_v40, 1  ;;  %v663_v43 = vadd.f32 %v662_v41, %v661_v39 }
 0x335   : > { %v658_v44 = vadd.f32 %v657_v42, %v656_v40  ;;  %v664_v45 = vrot.slane %v663_v43, 1 }
 0x337   : > { %v665_v46 = vadd.f32 %v664_v45, %v663_v43  ;;  %v666_v47 = vmul.f32 0.125, %v658_v44 }
 0x339   : > { %v667_v48 = vmul.f32 0.125, %v665_v46  ;;  %v668_v49 = vmul.f32 %v666_v47, %v666_v47  ;;  %v671_v53 = vsub.f32 %v650_v33, %v666_v47 }
 0x33b   : > { %v669_v50 = vsub.f32 %v667_v48, %v668_v49 }
 0x33d   : > { %v670_v51 = vmax.f32 %v669_v50, 0.0 }
 0x33f   : > { %v672_v52 = vadd.f32 1e-05, %v670_v51 }
 0x341   : > { %1064 = vrsqrt.f32 %v672_v52 }
 0x34e   : > { %v1065_v54 = vpop.eup %1064 }
 0x34f   : > { %v674_v56 = vmul.f32 %v1065_v54, %v671_v53 }
 0x351   : > { %v679_v58 = vmul.f32 %v818_v55, %v674_v56 }
 0x353   : > { %v684_v59 = vadd.f32 %v819_v57, %v679_v58 }
 0x355   : > { %v686_v60 = vmul.f32 0.70710677, %v684_v59  ;;  %v685_v62 = vmul.f32 0.5, %v684_v59 }
 0x357   : > { %1066 = verf.f32 %v686_v60 }
 0x364   : > { %v1067_v61 = vpop.eup %1066 }
 0x365   : > { %v688_v63 = vadd.f32 1.0, %v1067_v61 }
 0x367   : > { %v689_v0 = vmul.f32 %v688_v63, %v685_v62 }
 0x369   : > { %690 = vst [vmem:[%s1590_s6] sm:$0xff] %v689_v0 }
 0x36a PF: > { %p1016_p10 = scmp.eq.s32.totalorder %s1318_s25, 2  ;;  %s1263_s14 = smov [#allocation11]  }
 0x36b   : > { %s698_s10 = sshll.u32 %s1263_s14, 4  ;;  %s699_s10 = int_to_ptr.vmem [resolvable:$true] %s698_s10 }
 0x36c   : > { %s1176_s11 = scalar_lea.vmem %s699_s10, 128  ;;  %p1183_p1 = scmp.lt.s32.totalorder %s699_s10, %s699_s10 }
 0x36d   : > { %p1177_p11 = scmp.ne.s32.totalorder %s699_s10, %s1176_s11  ;;  %p1184_p4 = scmp.lt.s32.totalorder %s1176_s11, %s1176_s11 }
 0x36f   : > { %p1178_p12 = pnand %p1177_p11, %p1016_p10  ;;  %p1185_p13 = por %p1184_p4, %p1183_p1 }
 0x371   : > { %p1179_p0 = pneg %p1178_p12 }
 0x373   : > { %p1186_p5 = pnand %p1185_p13, %p1179_p0 }
 0x375   : > { %1189 = shalt.err (!%p1186_p5)
}
 0x376   : > { %994 = dma.vmem_to_hbm [thread:$0]  (%p1016_p10), %s699_s10, 128, %s1589_s5, [#allocation5]  }
 0x377   : > { %1233 = dma.done.wait (%p1016_p10), [#allocation5], 128  }
 0x378   : > { %1235 = vsyncadd (%p1016_p10), [#allocation5], 4294967168 }
 0x379 PF: > { %s1605_s19 = smov %s1381_s21  ;;  %p22_p8 = scmp.ge.s32.totalorder %s1368_s17, 5  }
 0x37a   : > { %s1606_s21 = smov %s1242_s22  ;;  %s1607_s22 = smov %s1246_s23 }
 0x37b   : > { %s1608_s23 = smov %s1605_s19  ;;  %s1609_s24 = smov %s1368_s17 }
 0x37c   :  { %24 = sbr.rel (!%p22_p8) target bundleno = 7 (0x7), region = 114 }
 0x381   :  { %717 = vsyncpa [#allocation4], 1 }
 0x382   :  { %719 = vsyncpa [#allocation4 + $0x1], 1 }
 0x383   :  { %720 = vsyncpa [#allocation7], 1 }
 0x384   :  { %722 = vsyncpa [#allocation7 + $0x1], 1 }
 0x385   :  { %723 = vsyncpa [#allocation10], 1 }
 0x386   :  { %724 = vsyncpa [#allocation5], 1 }
 0x387   :  { %726 = vsyncpa [#allocation5 + $0x1], 1 }

</bundles_post_ra>
